<compile_context>
chip_gen: v7x
topology: tpu7x:2x2x1
jax: 0.10.0
libtpu: 0.0.40
codegen_flags: <defaults>
</compile_context>

<pallas_src>
import functools

import jax
import jax.numpy as jnp
from jax.experimental import pallas as pl
from jax.experimental.pallas import tpu as pltpu


def _cdiv(a, b):
    return -(-a // b)


def _round_up(a, m):
    return _cdiv(a, m) * m


_ROW_ALIGN = {4: 8, 2: 16, 1: 32}   # native sublane tiling per itemsize


def _default_block_bytes():
    """Per-input block budget: big on 128 MiB-VMEM chips, smaller on v7x."""
    try:
        kind = jax.devices()[0].device_kind.lower()
    except Exception:
        return 6 * 1024 * 1024
    if "v5" in kind or "v6" in kind:
        return 8 * 1024 * 1024      # 128 MiB VMEM: amortize per-step overhead
    return 5 * 1024 * 1024          # v7x (64 MiB / TC) & unknown: keep headroom


def _static_pow(x, gamma):
    """x**gamma with small-integer gammas lowered to plain VPU multiplies."""
    if gamma == 0.0:
        return jnp.ones_like(x)
    if float(gamma).is_integer() and 1.0 <= gamma <= 4.0:
        r = x
        for _ in range(int(gamma) - 1):
            r = r * x
        return r
    return jnp.power(x, gamma)   # general (non-integer) gamma


def _focal_wbce_kernel(prob_ref, tgt_ref, part_ref, acc_ref, *,
                       weight, gamma, block_rows, lane,
                       steps_per_part, num_parts, total_valid, has_ragged):
    s = pl.program_id(1)

    @pl.when(s == 0)
    def _init():
        acc_ref[...] = jnp.zeros_like(acc_ref)

    def loss_of(p, t):
        eps = 1e-6
        p = jnp.clip(p, eps, 1.0 - eps)
        return (-weight) * _static_pow(1.0 - p, gamma) * t * jnp.log(p) \
            - _static_pow(p, gamma) * (1.0 - t) * jnp.log(1.0 - p)

    def accumulate(loss):
        # Fold the block into the small accumulator with pure vreg-wise VPU
        # adds (the (n,8,lane) reshape is a tile-aligned relabel: no movement).
        if block_rows % 8 == 0:
            if block_rows > 8:
                loss = loss.reshape(block_rows // 8, 8, lane).sum(axis=0)
            acc_ref[...] += loss
        else:
            # Only reachable in the single-block (block_rows == rows) case.
            acc_ref[...] += jnp.sum(loss, axis=0, keepdims=True)

    if not has_ragged:
        # Every block is full & valid: single mask-free fast path.
        accumulate(loss_of(prob_ref[...].astype(jnp.float32),
                           tgt_ref[...].astype(jnp.float32)))
    else:
        # Exactly one ragged block exists and it is the globally last one;
        # only that step pays the iota/compare/where cost.
        is_ragged = jnp.logical_and(pl.program_id(0) == num_parts - 1,
                                    s == steps_per_part - 1)

        @pl.when(jnp.logical_not(is_ragged))
        def _fast():
            accumulate(loss_of(prob_ref[...].astype(jnp.float32),
                               tgt_ref[...].astype(jnp.float32)))

        @pl.when(is_ragged)
        def _masked():
            p = prob_ref[...].astype(jnp.float32)
            t = tgt_ref[...].astype(jnp.float32)
            # The ragged block index is static, so its element offsets are
            # compile-time constants.
            row0 = (num_parts * steps_per_part - 1) * block_rows
            r = jax.lax.broadcasted_iota(jnp.int32, (block_rows, lane), 0) + row0
            c = jax.lax.broadcasted_iota(jnp.int32, (block_rows, lane), 1)
            valid = (r * lane + c) < total_valid
            # Sanitize BEFORE clip/log: out-of-bounds reads may be NaN/Inf.
            p = jnp.where(valid, p, 0.5)
            t = jnp.where(valid, t, 0.0)
            accumulate(jnp.where(valid, loss_of(p, t), 0.0))

    @pl.when(s == steps_per_part - 1)
    def _finalize():
        # One cross-sublane reduce per partition; lane-dense (1,1,lane) store.
        part_ref[...] = jnp.sum(acc_ref[...], axis=0, keepdims=True)[None]


def focal_wbce(output, target, *, weight=1.0, gamma=2.0, reduction="mean",
               block_bytes=None):
    """Focal weighted BCE. output/target: same shape; output is a probability
    map. Returns a scalar for reduction in {'mean','sum'}."""
    assert output.shape == target.shape, "shape mismatch"
    # TODO(synk): reduction='none' (per-element loss map) is a trivial
    # elementwise variant without the accumulator; only 'mean'/'sum' exposed.
    assert reduction in ("mean", "sum")

    if block_bytes is None:
        block_bytes = _default_block_bytes()

    total = output.size
    flat_p = output.reshape(-1)          # native dtype: no upcast, no copy
    flat_t = target.reshape(-1)

    # Lane width: largest candidate making the (rows, lane) view copy-free.
    lane = next((c for c in (2048, 1024, 512, 256, 128) if total % c == 0), None)
    pad = 0
    if lane is None:
        # Rare fallback (total not a multiple of 128): pad flat arrays by
        # < 128 elements; padded elements are masked in-kernel (no bias).
        lane = 128
        pad = (-total) % lane
        flat_p = jnp.pad(flat_p, (0, pad))
        flat_t = jnp.pad(flat_t, (0, pad))

    rows = (total + pad) // lane
    p2d = flat_p.reshape(rows, lane)
    t2d = flat_t.reshape(rows, lane)

    p_bytes = jnp.dtype(output.dtype).itemsize
    t_bytes = jnp.dtype(target.dtype).itemsize
    row_align = max(_ROW_ALIGN.get(p_bytes, 8), _ROW_ALIGN.get(t_bytes, 8))
    max_item = max(p_bytes, t_bytes)

    # Row-block: ~block_bytes per (widest-dtype) input block, tile-aligned.
    br_cap = max(row_align, block_bytes // (lane * max_item))
    if rows <= br_cap:
        block_rows = rows            # full extent: no alignment constraint
        num_blocks = 1
    else:
        block_rows = max(row_align, (br_cap // row_align) * row_align)
        num_blocks = _cdiv(rows, block_rows)

    # Exact partitioning: num_parts * steps == num_blocks. No clamped
    # duplicate tail steps => no wasted HBM re-fetches.
    num_parts = 1
    if num_blocks >= 2 and num_blocks % 2 == 0:
        num_parts = 2
    elif num_blocks >= 5:
        # Rebalance to an even block count so both v7x TCs get work; the one
        # extra (smaller) block is amortized over >=5 blocks.
        br2 = _round_up(_cdiv(rows, num_blocks + 1), row_align)
        nb2 = _cdiv(rows, br2)
        if nb2 % 2 == 0:
            block_rows, num_blocks, num_parts = br2, nb2, 2
    steps = num_blocks // num_parts
    assert num_parts * steps == num_blocks

    has_ragged = (pad > 0) or (rows % block_rows != 0)
    acc_rows = 8 if block_rows % 8 == 0 else 1

    kernel = functools.partial(
        _focal_wbce_kernel,
        weight=float(weight), gamma=float(gamma),
        block_rows=block_rows, lane=lane,
        steps_per_part=steps, num_parts=num_parts,
        total_valid=total, has_ragged=has_ragged)

    def in_index(pi, si):
        return (pi * steps + si, 0)

    # VMEM: 2 inputs x 2 pipeline buffers x block + small acc/out + headroom.
    in_block_bytes = block_rows * lane * (p_bytes + t_bytes)
    vmem_limit = int(min(max(2 * in_block_bytes + (6 << 20), 16 << 20), 64 << 20))

    cost = pl.CostEstimate(
        flops=int(14 * total),
        transcendentals=int(2 * total),
        bytes_accessed=int(total * (p_bytes + t_bytes) + num_parts * lane * 4))

    partials = pl.pallas_call(
        kernel,
        out_shape=jax.ShapeDtypeStruct((num_parts, 1, lane), jnp.float32),
        grid_spec=pltpu.PrefetchScalarGridSpec(
            num_scalar_prefetch=0,
            grid=(num_parts, steps),
            in_specs=[pl.BlockSpec((block_rows, lane), in_index),
                      pl.BlockSpec((block_rows, lane), in_index)],
            out_specs=pl.BlockSpec((1, 1, lane), lambda pi, si: (pi, 0, 0)),
            scratch_shapes=[pltpu.VMEM((acc_rows, lane), jnp.float32)],
        ),
        compiler_params=pltpu.CompilerParams(
            dimension_semantics=("parallel", "arbitrary"),
            vmem_limit_bytes=vmem_limit),
        cost_estimate=cost,
    )(p2d, t2d)

    total_loss = jnp.sum(partials)
    if reduction == "mean":
        return total_loss / total
    return total_loss


def focal_wbce_ref(output, target, *, weight=1.0, gamma=2.0, reduction="mean"):
    b = output.shape[0]
    p = jnp.clip(output.reshape(b, -1).astype(jnp.float32), 1e-6, 1.0 - 1e-6)
    t = target.reshape(b, -1).astype(jnp.float32)
    loss = -weight * (1.0 - p) ** gamma * t * jnp.log(p) \
        - p ** gamma * (1.0 - t) * jnp.log(1.0 - p)
    if reduction == "mean":
        return jnp.mean(loss)
    if reduction == "sum":
        return jnp.sum(loss)
    return loss


if __name__ == "__main__":
    key = jax.random.PRNGKey(0)

    def make(shape, dtype, k):
        k1, k2 = jax.random.split(k)
        out = jax.random.uniform(k1, shape, dtype=jnp.float32).astype(dtype)
        tgt = (jax.random.uniform(k2, shape) > 0.5).astype(dtype)
        return out, tgt

    configs = [
        # (shape, dtype, weight, gamma, reduction, block_bytes)
        # single lane-dense block, f32
        ((2, 1, 16, 16), jnp.float32, 2.0, 2.0, "mean", None),
        # small block budget -> multi-step grid + ragged last block masking
        ((2, 1, 144, 144), jnp.float32, 0.75, 2.0, "sum", 64 * 1024),
        # bf16 inputs streamed in native dtype, cast to f32 inside the kernel
        ((2, 4, 16, 16), jnp.bfloat16, 1.0, 1.0, "mean", None),
        # bf16 multi-block: 16-row alignment, 2-partition split, ragged tail
        ((2, 3, 40, 40), jnp.bfloat16, 1.25, 2.0, "mean", 16 * 1024),
        # total not a multiple of 128 -> padded-tail fallback + in-kernel mask
        ((2, 1, 9, 9), jnp.float32, 1.0, 3.0, "sum", None),
    ]

    for i, (shape, dtype, w, g, red, bb) in enumerate(configs):
        key, sub = jax.random.split(key)
        out, tgt = make(shape, dtype, sub)
        got = jax.block_until_ready(
            focal_wbce(out, tgt, weight=w, gamma=g, reduction=red,
                       block_bytes=bb))
        want = focal_wbce_ref(out, tgt, weight=w, gamma=g, reduction=red)
        assert jnp.allclose(got, want, rtol=1e-4, atol=1e-6), (i, got, want)

    print("KERNEL_OK")
</pallas_src>

<mosaic_0001>
module attributes {stable_mosaic.version = 11 : i64} {
  func.func @_focal_wbce_kernel(%arg0: i32, %arg1: i32, %arg2: memref<1x512xf32, #tpu.memory_space<vmem>>, %arg3: memref<1x512xf32, #tpu.memory_space<vmem>>, %arg4: memref<1x1x512xf32, #tpu.memory_space<vmem>>, %arg5: memref<1x512xf32, #tpu.memory_space<vmem>>) attributes {dimension_semantics = [#tpu.dimension_semantics<parallel>, #tpu.dimension_semantics<arbitrary>], iteration_bounds = array<i64: 1, 1>, scalar_prefetch = 0 : i64, scratch_operands = 1 : i64, tpu.core_type = #tpu.core_type<tc>, window_params = [{transform_indices = @transform_0, window_bounds = array<i64: 1, 512>}, {transform_indices = @transform_1, window_bounds = array<i64: 1, 512>}, {transform_indices = @transform_2, window_bounds = array<i64: 1, 1, 512>}]} {
    %c0_i32 = arith.constant 0 : i32
    %0 = arith.cmpi eq, %arg1, %c0_i32 : i32
    %1 = arith.extui %0 : i1 to i32
    %c0_i32_0 = arith.constant 0 : i32
    %2 = arith.cmpi ne, %1, %c0_i32_0 : i32
    scf.if %2 {
      %cst_16 = arith.constant 0.000000e+00 : f32
      %34 = vector.broadcast %cst_16 : f32 to vector<1x512xf32>
      %c0_17 = arith.constant 0 : index
      %c0_18 = arith.constant 0 : index
      %35 = vector.load %arg5[%c0_17, %c0_18] : memref<1x512xf32, #tpu.memory_space<vmem>>, vector<1x512xf32>
      tpu.vector_store %arg5[%c0_17, %c0_18], %34 {strides = array<i32>} : memref<1x512xf32, #tpu.memory_space<vmem>>, vector<1x512xf32>,
    } else {
    }
    %c0 = arith.constant 0 : index
    %c0_1 = arith.constant 0 : index
    %3 = vector.load %arg2[%c0, %c0_1] : memref<1x512xf32, #tpu.memory_space<vmem>>, vector<1x512xf32>
    %c0_2 = arith.constant 0 : index
    %c0_3 = arith.constant 0 : index
    %4 = vector.load %arg3[%c0_2, %c0_3] : memref<1x512xf32, #tpu.memory_space<vmem>>, vector<1x512xf32>
    %cst = arith.constant 9.99999997E-7 : f32
    %cst_4 = arith.constant 0.999998986 : f32
    %5 = vector.broadcast %cst : f32 to vector<1x512xf32>
    %6 = arith.maximumf %5, %3 : vector<1x512xf32>
    %7 = vector.broadcast %cst_4 : f32 to vector<1x512xf32>
    %8 = arith.minimumf %7, %6 : vector<1x512xf32>
    %cst_5 = arith.constant 1.000000e+00 : f32
    %9 = vector.broadcast %cst_5 : f32 to vector<1x512xf32>
    %10 = arith.subf %9, %8 : vector<1x512xf32>
    %11 = arith.mulf %10, %10 : vector<1x512xf32>
    %cst_6 = arith.constant -2.000000e+00 : f32
    %12 = vector.broadcast %cst_6 : f32 to vector<1x512xf32>
    %13 = arith.mulf %12, %11 : vector<1x512xf32>
    %14 = arith.mulf %13, %4 : vector<1x512xf32>
    %15 = math.log %8 : vector<1x512xf32>
    %16 = arith.mulf %14, %15 : vector<1x512xf32>
    %17 = arith.mulf %8, %8 : vector<1x512xf32>
    %cst_7 = arith.constant 1.000000e+00 : f32
    %18 = vector.broadcast %cst_7 : f32 to vector<1x512xf32>
    %19 = arith.subf %18, %4 : vector<1x512xf32>
    %20 = arith.mulf %17, %19 : vector<1x512xf32>
    %cst_8 = arith.constant 1.000000e+00 : f32
    %21 = vector.broadcast %cst_8 : f32 to vector<1x512xf32>
    %22 = arith.subf %21, %8 : vector<1x512xf32>
    %23 = math.log %22 : vector<1x512xf32>
    %24 = arith.mulf %20, %23 : vector<1x512xf32>
    %25 = arith.subf %16, %24 : vector<1x512xf32>
    %c0_9 = arith.constant 0 : index
    %c0_10 = arith.constant 0 : index
    %26 = vector.load %arg5[%c0_9, %c0_10] : memref<1x512xf32, #tpu.memory_space<vmem>>, vector<1x512xf32>
    %cst_11 = arith.constant dense<0.000000e+00> : vector<512xf32>
    %27 = vector.multi_reduction <add>, %25, %cst_11 [0] : vector<1x512xf32> to vector<512xf32>
    %28 = vector.shape_cast %27 : vector<512xf32> to vector<1x512xf32>
    %29 = arith.addf %26, %28 : vector<1x512xf32>
    %c0_12 = arith.constant 0 : index
    %c0_13 = arith.constant 0 : index
    %30 = vector.load %arg5[%c0_12, %c0_13] : memref<1x512xf32, #tpu.memory_space<vmem>>, vector<1x512xf32>
    tpu.vector_store %arg5[%c0_12, %c0_13], %29 {strides = array<i32>} : memref<1x512xf32, #tpu.memory_space<vmem>>, vector<1x512xf32>,
    %c0_i32_14 = arith.constant 0 : i32
    %31 = arith.cmpi eq, %arg1, %c0_i32_14 : i32
    %32 = arith.extui %31 : i1 to i32
    %c0_i32_15 = arith.constant 0 : i32
    %33 = arith.cmpi ne, %32, %c0_i32_15 : i32
    scf.if %33 {
      %c0_16 = arith.constant 0 : index
      %c0_17 = arith.constant 0 : index
      %34 = vector.load %arg5[%c0_16, %c0_17] : memref<1x512xf32, #tpu.memory_space<vmem>>, vector<1x512xf32>
      %cst_18 = arith.constant dense<0.000000e+00> : vector<512xf32>
      %35 = vector.multi_reduction <add>, %34, %cst_18 [0] : vector<1x512xf32> to vector<512xf32>
      %36 = vector.shape_cast %35 : vector<512xf32> to vector<1x512xf32>
      %37 = vector.shape_cast %36 : vector<1x512xf32> to vector<1x1x512xf32>
      %c0_19 = arith.constant 0 : index
      %c0_20 = arith.constant 0 : index
      %c0_21 = arith.constant 0 : index
      %38 = vector.load %arg4[%c0_19, %c0_20, %c0_21] : memref<1x1x512xf32, #tpu.memory_space<vmem>>, vector<1x1x512xf32>
      tpu.vector_store %arg4[%c0_19, %c0_20, %c0_21], %37 {strides = array<i32>} : memref<1x1x512xf32, #tpu.memory_space<vmem>>, vector<1x1x512xf32>,
    } else {
    }
    return
  }
  func.func @transform_0(%arg0: i32, %arg1: i32) -> (i32, i32) {
    %c1_i32 = arith.constant 1 : i32
    %0 = arith.muli %arg0, %c1_i32 : i32
    %1 = arith.addi %0, %arg1 : i32
    %c0_i32 = arith.constant 0 : i32
    %c0_i32_0 = arith.constant 0 : i32
    return %1, %c0_i32 : i32, i32
  }
  func.func @transform_1(%arg0: i32, %arg1: i32) -> (i32, i32) {
    %c1_i32 = arith.constant 1 : i32
    %0 = arith.muli %arg0, %c1_i32 : i32
    %1 = arith.addi %0, %arg1 : i32
    %c0_i32 = arith.constant 0 : i32
    %c0_i32_0 = arith.constant 0 : i32
    return %1, %c0_i32 : i32, i32
  }
  func.func @transform_2(%arg0: i32, %arg1: i32) -> (i32, i32, i32) {
    %c0_i32 = arith.constant 0 : i32
    %c0_i32_0 = arith.constant 0 : i32
    %c0_i32_1 = arith.constant 0 : i32
    return %arg0, %c0_i32, %c0_i32_0 : i32, i32, i32
  }
}

</mosaic_0001>

<bundles_post_ra>
// kernel: tpu_custom_call.1
= control target key start
LH: loop header
LB: loop body
LE: loop exit
PB: predicated region body
PF: predicated region fallthrough
CT: control target
= control target key end

     0   :  { %7 = vsyncpa [#allocation4], 0  ;;  %s248_s0 = inlined_call_operand.hbm [shape: f32[1,512], index: 0, kind: input, shape index: {}]   ;;  %s249_s1 = inlined_call_operand.hbm [shape: f32[1,512], index: 1, kind: input, shape index: {}]   ;;  %s250_s2 = inlined_call_operand.hbm [shape: f32[1,1,512], index: 2, kind: output, shape index: {}]  }
   0x1   :  { %8 = vsyncpa [#allocation7], 0 }
   0x2   :  { %9 = vsyncpa [#allocation5], 0  ;;  %s183_s9 = smov [#allocation3]   ;;  %s184_s11 = smov [#allocation6]  }
   0x3   :  { %s20_s10 = sshll.u32 %s183_s9, 4  ;;  %s34_s12 = sshll.u32 %s184_s11, 4  ;;  %s21_s10 = int_to_ptr.vmem [resolvable:$true] %s20_s10  ;;  %s35_s12 = int_to_ptr.vmem [resolvable:$true] %s34_s12 }
   0x4   :  { %s111_s15 = scalar_lea.hbm %s248_s0, 64 }
   0x5   :  { %p112_p0 = scmp.ne.s32.totalorder %s248_s0, %s111_s15  ;;  %p115_p1 = scmp.lt.u32.totalorder %s111_s15, %s248_s0 }
   0x7   :  { %p117_p2 = pnand %p115_p1, %p112_p0 }
   0x9   :  { %120 = shalt.err (!%p117_p2)
}
   0xa   :  { %s121_s20 = scalar_lea.vmem %s21_s10, 64  ;;  %p126_p4 = scmp.lt.s32.totalorder %s21_s10, %s21_s10 }
   0xb   :  { %p122_p3 = scmp.ne.s32.totalorder %s21_s10, %s121_s20  ;;  %p127_p5 = scmp.lt.s32.totalorder %s121_s20, %s121_s20 }
   0xd   :  { %p128_p6 = por %p127_p5, %p126_p4 }
   0xf   :  { %p129_p7 = pnand %p128_p6, %p122_p3 }
  0x11   :  { %132 = shalt.err (!%p129_p7)
}
  0x12   :  { %23 = dma.hbm_to_vmem [thread:$0]  %s248_s0, 64, %s21_s10, [#allocation4]  }
  0x13   :  { %s133_s25 = scalar_lea.hbm %s249_s1, 64 }
  0x14   :  { %p134_p8 = scmp.ne.s32.totalorder %s249_s1, %s133_s25  ;;  %p137_p9 = scmp.lt.u32.totalorder %s133_s25, %s249_s1 }
  0x16   :  { %p139_p10 = pnand %p137_p9, %p134_p8 }
  0x18   :  { %142 = shalt.err (!%p139_p10)
}
  0x19   :  { %s143_s30 = scalar_lea.vmem %s35_s12, 64  ;;  %p148_p12 = scmp.lt.s32.totalorder %s35_s12, %s35_s12 }
  0x1a   :  { %p144_p11 = scmp.ne.s32.totalorder %s35_s12, %s143_s30  ;;  %p149_p13 = scmp.lt.s32.totalorder %s143_s30, %s143_s30 }
  0x1c   :  { %p150_p0 = por %p149_p13, %p148_p12 }
  0x1e   :  { %p151_p1 = pnand %p150_p0, %p144_p11 }
  0x20   :  { %154 = shalt.err (!%p151_p1)
}
  0x21   :  { %37 = dma.hbm_to_vmem [thread:$0]  %s249_s1, 64, %s35_s12, [#allocation7]  }
  0x22   :  { %177 = dma.done.wait [#allocation4], 64  }
  0x23   :  { %178 = vsyncadd [#allocation4], 4294967232 }
  0x24   :  { %179 = dma.done.wait [#allocation7], 64  }
  0x25   :  { %180 = vsyncadd [#allocation7], 4294967232  ;;  %v50_v0 = vlaneseq  ;;  %v185_v2 = vmov 0.0   ;;  %v55_v3 = vld [vmem:[#allocation3] sm:$0xf]  ;;  %s186_s1 = smov [#allocation8]  }
  0x26   :  { %v57_v4 = vmax.f32 %v55_v3, 1e-06  ;;  %v56_v8 = vld [vmem:[#allocation6] sm:$0xf]  ;;  %s93_s4 = sshll.u32 %s186_s1, 4  ;;  %s94_s4 = int_to_ptr.vmem [resolvable:$true] %s93_s4 }
  0x27   :  { %vm226_vm0 = vcmp.lt.s32.totalorder %v50_v0, 512  ;;  %v67_v11 = vsub.f32 1.0, %v56_v8  ;;  %s155_s5 = scalar_lea.vmem %s94_s4, 64  ;;  %p160_p3 = scmp.lt.s32.totalorder %s94_s4, %s94_s4 }
  0x28   :  { %54 = vst.msk [vmem:[#allocation2] sm:$0xf] %vm226_vm0, %v185_v2  ;;  %v58_v5 = vmin.f32 %v57_v4, 0.999999  ;;  %p156_p2 = scmp.ne.s32.totalorder %s94_s4, %s155_s5  ;;  %p161_p4 = scmp.lt.s32.totalorder %s155_s5, %s155_s5 }
  0x2a   :  { %v59_v6 = vsub.f32 1.0, %v58_v5  ;;  %107 = vlog2.f32 %v58_v5  ;;  %v66_v10 = vmul.f32 %v58_v5, %v58_v5  ;;  %p162_p5 = por %p161_p4, %p160_p3 }
  0x2c   :  { %v60_v7 = vmul.f32 %v59_v6, %v59_v6  ;;  %109 = vlog2.f32 %v59_v6  ;;  %v68_v15 = vmul.f32 %v67_v11, %v66_v10  ;;  %p163_p6 = pnand %p162_p5, %p156_p2 }
  0x2e   :  { %v61_v9 = vmul.f32 -2.0, %v60_v7 }
  0x2f   :  { %v73_v20 = vld [vmem:[#allocation2] sm:$0xf] }
  0x30   :  { %v62_v12 = vmul.f32 %v61_v9, %v56_v8 }
  0x34   :  { %v108_v13 = vpop.eup %107 }
  0x35   :  { %v64_v14 = vmul.f32 0.6931472, %v108_v13 }
  0x36   :  { %v110_v16 = vpop.eup %109 }
  0x37   :  { %v65_v17 = vmul.f32 %v64_v14, %v62_v12  ;;  %v70_v18 = vmul.f32 0.6931472, %v110_v16 }
  0x39   :  { %v71_v19 = vmul.f32 %v70_v18, %v68_v15 }
  0x3b   :  { %v72_v21 = vsub.f32 %v65_v17, %v71_v19 }
  0x3d   :  { %v75_v22 = vadd.f32 %v73_v20, %v72_v21 }
  0x3f   :  { %80 = vst.msk [vmem:[#allocation2] sm:$0xf] %vm226_vm0, %v75_v22 }
  0x46   :  { %v84_v23 = vld [vmem:[#allocation2] sm:$0xf] }
  0x47   :  { %86 = vst.msk [vmem:[#allocation8] sm:$0xf] %vm226_vm0, %v84_v23 }
  0x48   :  { %166 = shalt.err (!%p163_p6)
}
  0x49   :  { %s167_s8 = scalar_lea.hbm %s250_s2, 64 }
  0x4a   :  { %p168_p7 = scmp.ne.s32.totalorder %s250_s2, %s167_s8  ;;  %p171_p8 = scmp.lt.u32.totalorder %s167_s8, %s250_s2 }
  0x4c   :  { %p173_p9 = pnand %p171_p8, %p168_p7 }
  0x4e   :  { %176 = shalt.err (!%p173_p9)
}
  0x4f   :  { %96 = dma.vmem_to_hbm [thread:$0]  %s94_s4, 64, %s250_s2, [#allocation5]  }
  0x50   :  { %181 = dma.done.wait [#allocation5], 64  }
  0x51   :  { %182 = vsyncadd [#allocation5], 4294967232 }
  0x52   :  { %100 = vsyncpa [#allocation4], 1 }
  0x53   :  { %101 = vsyncpa [#allocation7], 1 }
  0x54   :  { %102 = vsyncpa [#allocation5], 1 }

</bundles_post_ra>
